<compile_context>
chip_gen: v6e
topology: v6e:2x2x1
jax: 0.10.0
libtpu: 0.0.40
codegen_flags: <defaults>
</compile_context>

<pallas_src>
import functools

import jax
import jax.numpy as jnp
from jax.experimental import pallas as pl
from jax.experimental.pallas import tpu as pltpu

EPS = 1e-5
DEFAULT_BLOCK_BUDGET = 2 << 20   # ~2 MiB x-block: near-roofline streaming tiles,
                                 # safe on v5e (16 MiB scoped default) and v7x
                                 # (64 MiB physical VMEM) with double buffering.


# ------------------------------- kernels ----------------------------------- #

def _revin_norm_kernel(x_ref, w_ref, b_ref, out_ref, mean_ref, std_ref, *, eps):
    """Fused stats + normalize.  x_ref: (bb, T, ct); w_ref/b_ref: (1, ct)."""
    t = x_ref.shape[1]
    inv_t = jnp.float32(1.0 / t)

    # Pass 1: mean (f32 accumulation).
    mean = jnp.sum(x_ref[...].astype(jnp.float32), axis=1, keepdims=True) * inv_t

    # Pass 2: centered (two-pass) variance -- avoids E[x^2]-E[x]^2 cancellation
    # when |mean| >> std.  The block is already resident in VMEM and the kernel
    # is HBM-bound, so the extra VMEM-local pass is essentially free.
    d = x_ref[...].astype(jnp.float32) - mean
    var = jnp.sum(d * d, axis=1, keepdims=True) * inv_t

    inv_std = jax.lax.rsqrt(var + eps)                 # EUP slot, tiny array
    std = jnp.sqrt(var + eps)

    w = w_ref[...].astype(jnp.float32)[:, None, :]     # (1, 1, ct)
    b = b_ref[...].astype(jnp.float32)[:, None, :]
    scale = inv_std * w                                # (bb, 1, ct)
    shift = b - mean * scale

    if x_ref.dtype == jnp.float32:
        out_ref[...] = (x_ref[...] * scale + shift).astype(out_ref.dtype)
    else:
        # bf16/fp16: keep the big scale/shift pass in the native dtype
        # (bf16 VALU exists on v6e/v7x) -- no block-sized f32 apply temporary.
        xn = x_ref[...]
        out_ref[...] = (xn * scale.astype(xn.dtype)
                        + shift.astype(xn.dtype)).astype(out_ref.dtype)

    mean_ref[...] = mean.astype(mean_ref.dtype)
    std_ref[...] = std.astype(std_ref.dtype)


def _revin_stats_kernel(x_ref, mean_ref, std_ref, s1_ref, s2_ref, c_ref, *,
                        eps, t_total):
    """T-tiled stats reduction.  Grid (B, C/ct, T/tt); last axis 'arbitrary'."""
    k = pl.program_id(2)

    @pl.when(k == 0)
    def _():
        # Shifted accumulation: var(x) == var(x - c).  Using the first time
        # step as c keeps s2 - s1^2/T well conditioned even when |mean| >> std.
        c_ref[...] = x_ref[:, 0:1, :].astype(jnp.float32)
        s1_ref[...] = jnp.zeros_like(s1_ref)
        s2_ref[...] = jnp.zeros_like(s2_ref)

    xc = x_ref[...].astype(jnp.float32) - c_ref[...]
    s1_ref[...] += jnp.sum(xc, axis=1, keepdims=True)
    s2_ref[...] += jnp.sum(xc * xc, axis=1, keepdims=True)

    @pl.when(k == pl.num_programs(2) - 1)
    def _():
        inv_t = jnp.float32(1.0 / t_total)
        m = s1_ref[...] * inv_t
        var = jnp.maximum(s2_ref[...] * inv_t - m * m, 0.0)
        mean_ref[...] = (m + c_ref[...]).astype(mean_ref.dtype)
        std_ref[...] = jnp.sqrt(var + eps).astype(std_ref.dtype)


def _revin_norm_apply_kernel(x_ref, mean_ref, std_ref, w_ref, b_ref, out_ref):
    """Elementwise (x - mean) / std * w + b on a (bb, tt, ct) block."""
    mean = mean_ref[...].astype(jnp.float32)           # (bb, 1, ct)
    std = std_ref[...].astype(jnp.float32)
    w = w_ref[...].astype(jnp.float32)[:, None, :]
    b = b_ref[...].astype(jnp.float32)[:, None, :]
    scale = w / std                                    # tiny (bb, 1, ct) divide
    shift = b - mean * scale
    if x_ref.dtype == jnp.float32:
        out_ref[...] = (x_ref[...] * scale + shift).astype(out_ref.dtype)
    else:
        xn = x_ref[...]
        out_ref[...] = (xn * scale.astype(xn.dtype)
                        + shift.astype(xn.dtype)).astype(out_ref.dtype)


def _revin_denorm_kernel(x_ref, mean_ref, std_ref, w_ref, b_ref, out_ref, *, eps):
    """Elementwise ((x - b) / (w + eps^2)) * std + mean on a (bb, tt, ct) block."""
    mean = mean_ref[...].astype(jnp.float32)           # (bb, 1, ct)
    std = std_ref[...].astype(jnp.float32)
    w = w_ref[...].astype(jnp.float32)[:, None, :]
    b = b_ref[...].astype(jnp.float32)[:, None, :]
    inv_w = 1.0 / (w + eps * eps)                      # tiny (1, 1, ct) divide
    scale = std * inv_w
    shift = mean - b * scale
    if x_ref.dtype == jnp.float32:
        out_ref[...] = (x_ref[...] * scale + shift).astype(out_ref.dtype)
    else:
        xn = x_ref[...]
        out_ref[...] = (xn * scale.astype(xn.dtype)
                        + shift.astype(xn.dtype)).astype(out_ref.dtype)


# ---------------------------- tiling helpers -------------------------------- #

def _largest_divisor_leq(n, cap, multiple_of=1):
    best = None
    for d in range(1, n + 1):
        if n % d == 0 and d % multiple_of == 0 and d <= cap:
            best = d
    return best


def _pick_ct(c, t, itemsize, budget):
    if c % 128 == 0 and t * c * itemsize > budget:
        cap = max(128, budget // max(1, t * itemsize))
        cand = _largest_divisor_leq(c, cap, multiple_of=128)
        if cand is not None:
            return cand
    return c


def _pick_tt(t, ct, itemsize, budget):
    if t * ct * itemsize > budget:
        cap = max(8, budget // max(1, ct * itemsize))
        cand = _largest_divisor_leq(t, cap, multiple_of=8)
        if cand is not None:
            return cand
    return t


def _pick_bb(b, tt, ct, itemsize, budget):
    cap = max(1, budget // max(1, tt * ct * itemsize))
    return _largest_divisor_leq(b, cap) or 1


def _ensure_min_grid(b, t, c, bb, tt, ct, *, allow_t_split, min_steps=2):
    """Shrink tiles (when possible) so the grid has >= min_steps steps.

    v7x shards "parallel" grid axes across its two TensorCores; a single-step
    grid idles one core and disables DMA/compute pipelining entirely.
    """
    def steps():
        return (b // bb) * (t // tt) * (c // ct)

    if steps() < min_steps and b >= 2:
        cand = _largest_divisor_leq(b, max(1, b // 2))
        if cand:
            bb = cand
    if steps() < min_steps and ct % 256 == 0:
        cand = _largest_divisor_leq(c, ct // 2, multiple_of=128)
        if cand:
            ct = cand
    if steps() < min_steps and allow_t_split and tt % 16 == 0:
        cand = _largest_divisor_leq(t, tt // 2, multiple_of=8)
        if cand:
            tt = cand
    return bb, tt, ct


def _compiler_params(block_elems, in_itemsize, out_itemsize, semantics):
    # 2x double-buffered input block + 2x output block + ~2 block-sized f32
    # in-kernel temporaries + slack for the small operands.  Cap at 64 MiB so
    # v7x (64 MiB physical VMEM) still fits; 32 MiB floor is safe everywhere.
    need = block_elems * (2 * in_itemsize + 2 * out_itemsize + 8) + (4 << 20)
    vmem_limit = int(min(64 << 20, max(32 << 20, need)))
    return pltpu.CompilerParams(dimension_semantics=semantics,
                                vmem_limit_bytes=vmem_limit)


# ------------------------------- wrappers ------------------------------------ #

def revin_norm(x, weight, bias, *, eps=EPS, block_budget_bytes=DEFAULT_BLOCK_BUDGET):
    """mode='norm'.  Returns (x_normalized, mean, stdev); mean/stdev are (B,1,C) f32."""
    B, T, C = x.shape
    itemsize = jnp.dtype(x.dtype).itemsize
    w2 = weight.reshape(1, C)
    b2 = bias.reshape(1, C)

    ct = _pick_ct(C, T, itemsize, block_budget_bytes)
    fused = T * ct * itemsize <= 2 * block_budget_bytes
    tt = T
    if not fused:
        tt = _pick_tt(T, ct, itemsize, block_budget_bytes)
        if tt >= T:                 # T cannot be tiled cleanly -> single block
            fused = True
            tt = T

    if fused:
        bb = _pick_bb(B, T, ct, itemsize, block_budget_bytes)
        bb, _, ct = _ensure_min_grid(B, T, C, bb, T, ct, allow_t_split=False)
        grid = (B // bb, C // ct)
        out_shapes = (
            jax.ShapeDtypeStruct((B, T, C), x.dtype),       # normalized x
            jax.ShapeDtypeStruct((B, 1, C), jnp.float32),   # mean
            jax.ShapeDtypeStruct((B, 1, C), jnp.float32),   # stdev
        )
        grid_spec = pltpu.PrefetchScalarGridSpec(
            num_scalar_prefetch=0,
            grid=grid,
            in_specs=[
                pl.BlockSpec((bb, T, ct), lambda i, j: (i, 0, j)),
                pl.BlockSpec((1, ct), lambda i, j: (0, j)),
                pl.BlockSpec((1, ct), lambda i, j: (0, j)),
            ],
            out_specs=[
                pl.BlockSpec((bb, T, ct), lambda i, j: (i, 0, j)),
                pl.BlockSpec((bb, 1, ct), lambda i, j: (i, 0, j)),
                pl.BlockSpec((bb, 1, ct), lambda i, j: (i, 0, j)),
            ],
        )
        xn, mean, std = pl.pallas_call(
            functools.partial(_revin_norm_kernel, eps=eps),
            out_shape=out_shapes,
            grid_spec=grid_spec,
            compiler_params=_compiler_params(
                bb * T * ct, itemsize, itemsize, ("parallel", "parallel")),
        )(x, w2, b2)
        return xn, mean, std

    # ---- fallback: T-tiled two-kernel path --------------------------------- #
    # Stats reduction (grid T axis "arbitrary", running shifted accumulators in
    # VMEM scratch), then an elementwise apply pass.  Costs one extra HBM read
    # of x but keeps blocks roofline-friendly when a full-T block will not fit.
    grid = (B, C // ct, T // tt)
    mean, std = pl.pallas_call(
        functools.partial(_revin_stats_kernel, eps=eps, t_total=T),
        out_shape=(jax.ShapeDtypeStruct((B, 1, C), jnp.float32),
                   jax.ShapeDtypeStruct((B, 1, C), jnp.float32)),
        grid_spec=pltpu.PrefetchScalarGridSpec(
            num_scalar_prefetch=0,
            grid=grid,
            in_specs=[pl.BlockSpec((1, tt, ct), lambda i, j, k: (i, k, j))],
            out_specs=[pl.BlockSpec((1, 1, ct), lambda i, j, k: (i, 0, j)),
                       pl.BlockSpec((1, 1, ct), lambda i, j, k: (i, 0, j))],
            scratch_shapes=[pltpu.VMEM((1, 1, ct), jnp.float32)] * 3),
        compiler_params=_compiler_params(
            tt * ct, itemsize, 4, ("parallel", "parallel", "arbitrary")),
    )(x)
    xn = pl.pallas_call(
        _revin_norm_apply_kernel,
        out_shape=jax.ShapeDtypeStruct((B, T, C), x.dtype),
        grid_spec=pltpu.PrefetchScalarGridSpec(
            num_scalar_prefetch=0,
            grid=grid,
            in_specs=[
                pl.BlockSpec((1, tt, ct), lambda i, j, k: (i, k, j)),
                pl.BlockSpec((1, 1, ct), lambda i, j, k: (i, 0, j)),
                pl.BlockSpec((1, 1, ct), lambda i, j, k: (i, 0, j)),
                pl.BlockSpec((1, ct), lambda i, j, k: (0, j)),
                pl.BlockSpec((1, ct), lambda i, j, k: (0, j)),
            ],
            out_specs=pl.BlockSpec((1, tt, ct), lambda i, j, k: (i, k, j))),
        compiler_params=_compiler_params(
            tt * ct, itemsize, itemsize, ("parallel", "parallel", "parallel")),
    )(x, mean, std, w2, b2)
    return xn, mean, std


def revin_denorm(x, mean, stdev, weight, bias, *, eps=EPS,
                 block_budget_bytes=DEFAULT_BLOCK_BUDGET):
    """mode='denorm'.  Inverts revin_norm using the saved statistics."""
    B, T, C = x.shape
    itemsize = jnp.dtype(x.dtype).itemsize
    mean3 = mean.reshape(B, 1, C)
    std3 = stdev.reshape(B, 1, C)
    w2 = weight.reshape(1, C)
    b2 = bias.reshape(1, C)

    ct = _pick_ct(C, T, itemsize, block_budget_bytes)
    tt = _pick_tt(T, ct, itemsize, block_budget_bytes)
    bb = _pick_bb(B, tt, ct, itemsize, block_budget_bytes)
    bb, tt, ct = _ensure_min_grid(B, T, C, bb, tt, ct, allow_t_split=True)
    grid = (B // bb, C // ct, T // tt)

    grid_spec = pltpu.PrefetchScalarGridSpec(
        num_scalar_prefetch=0,
        grid=grid,
        in_specs=[
            pl.BlockSpec((bb, tt, ct), lambda i, j, k: (i, k, j)),
            pl.BlockSpec((bb, 1, ct), lambda i, j, k: (i, 0, j)),
            pl.BlockSpec((bb, 1, ct), lambda i, j, k: (i, 0, j)),
            pl.BlockSpec((1, ct), lambda i, j, k: (0, j)),
            pl.BlockSpec((1, ct), lambda i, j, k: (0, j)),
        ],
        out_specs=pl.BlockSpec((bb, tt, ct), lambda i, j, k: (i, k, j)),
    )
    out = pl.pallas_call(
        functools.partial(_revin_denorm_kernel, eps=eps),
        out_shape=jax.ShapeDtypeStruct((B, T, C), x.dtype),
        grid_spec=grid_spec,
        compiler_params=_compiler_params(
            bb * tt * ct, itemsize, itemsize, ("parallel",) * 3),
    )(x, mean3, std3, w2, b2)
    return out


# ------------------------------- reference ----------------------------------- #

def _ref_norm(x, weight, bias, eps=EPS):
    mean = jnp.mean(x, axis=1, keepdims=True)
    var = jnp.var(x, axis=1, keepdims=True)   # ddof=0 == unbiased=False
    std = jnp.sqrt(var + eps)
    xn = (x - mean) / std
    xn = xn * weight + bias
    return xn, mean, std


def _ref_denorm(x, mean, std, weight, bias, eps=EPS):
    x = x - bias
    x = x / (weight + eps * eps)
    x = x * std
    x = x + mean
    return x


# --------------------------------- main --------------------------------------- #

if __name__ == "__main__":
    key = jax.random.PRNGKey(0)

    def make_inputs(B, T, C, dtype):
        kx = jax.random.fold_in(key, B * 100003 + T * 1009 + C)
        x = jax.random.normal(kx, (B, T, C), dtype=jnp.float32) * 3.0 + 1.5
        x = x.astype(dtype)
        w = jnp.ones((C,), jnp.float32) + 0.01 * jnp.arange(C, dtype=jnp.float32)
        b = jnp.full((C,), 0.1, jnp.float32)
        return x, w, b

    def run_case(B, T, C, budget, dtype=jnp.float32,
                 norm_tol=1e-4, stats_tol=1e-4, rt_tol=1e-3):
        x, w, b = make_inputs(B, T, C, dtype)
        xn, mean, std = revin_norm(x, w, b, block_budget_bytes=budget)
        xd = revin_denorm(xn, mean, std, w, b, block_budget_bytes=budget)
        jax.block_until_ready((xn, mean, std, xd))

        xf = x.astype(jnp.float32)
        xn_r, mean_r, std_r = _ref_norm(xf, w, b)
        xd_r = _ref_denorm(xn_r, mean_r, std_r, w, b)

        assert bool(jnp.allclose(xn.astype(jnp.float32), xn_r,
                                 atol=norm_tol, rtol=norm_tol)), "norm mismatch"
        assert bool(jnp.allclose(mean, mean_r,
                                 atol=stats_tol, rtol=stats_tol)), "mean mismatch"
        assert bool(jnp.allclose(std, std_r,
                                 atol=stats_tol, rtol=stats_tol)), "std mismatch"
        assert bool(jnp.allclose(xd.astype(jnp.float32), xd_r,
                                 atol=rt_tol, rtol=rt_tol)), "denorm mismatch"
        assert bool(jnp.allclose(xd.astype(jnp.float32), xf,
                                 atol=rt_tol, rtol=rt_tol)), "round-trip mismatch"

    # 1) default budget: whole problem fits one block -> min-grid split keeps
    #    >= 2 parallel steps (both v7x TCs busy).
    run_case(B=8, T=16, C=32, budget=DEFAULT_BLOCK_BUDGET)
    # 2) tiny budget forces multiple batch-tiled grid steps.
    run_case(B=8, T=16, C=32, budget=4096)
    # 3) C multiple of 128, tiny budget forces a channel-tile grid axis.
    run_case(B=2, T=8, C=256, budget=4096)
    # 4) C not 128-tileable and T too long for the budget -> T-tiled two-kernel
    #    fallback (running shifted accumulators + apply pass).
    run_case(B=2, T=64, C=24, budget=2048)
    # 5) bf16 input: f32 stats accumulation, native-dtype apply pass.
    run_case(B=4, T=32, C=32, budget=DEFAULT_BLOCK_BUDGET, dtype=jnp.bfloat16,
             norm_tol=1e-1, stats_tol=1e-3, rt_tol=5e-1)

    print("KERNEL_OK")
</pallas_src>

<mosaic_0001>
module attributes {stable_mosaic.version = 11 : i64} {
  func.func @_revin_norm_kernel(%arg0: i32, %arg1: i32, %arg2: memref<4x16x32xf32, #tpu.memory_space<vmem>>, %arg3: memref<1x32xf32, #tpu.memory_space<vmem>>, %arg4: memref<1x32xf32, #tpu.memory_space<vmem>>, %arg5: memref<4x16x32xf32, #tpu.memory_space<vmem>>, %arg6: memref<4x1x32xf32, #tpu.memory_space<vmem>>, %arg7: memref<4x1x32xf32, #tpu.memory_space<vmem>>) attributes {dimension_semantics = [#tpu.dimension_semantics<parallel>, #tpu.dimension_semantics<parallel>], iteration_bounds = array<i64: 2, 1>, scalar_prefetch = 0 : i64, scratch_operands = 0 : i64, tpu.core_type = #tpu.core_type<tc>, window_params = [{transform_indices = @transform_0, window_bounds = array<i64: 4, 16, 32>}, {transform_indices = @transform_1, window_bounds = array<i64: 1, 32>}, {transform_indices = @transform_2, window_bounds = array<i64: 1, 32>}, {transform_indices = @transform_3, window_bounds = array<i64: 4, 16, 32>}, {transform_indices = @transform_4, window_bounds = array<i64: 4, 1, 32>}, {transform_indices = @transform_5, window_bounds = array<i64: 4, 1, 32>}]} {
    %c0 = arith.constant 0 : index
    %c0_0 = arith.constant 0 : index
    %c0_1 = arith.constant 0 : index
    %0 = vector.load %arg2[%c0, %c0_0, %c0_1] : memref<4x16x32xf32, #tpu.memory_space<vmem>>, vector<4x16x32xf32>
    %cst = arith.constant dense<0.000000e+00> : vector<4x32xf32>
    %1 = vector.multi_reduction <add>, %0, %cst [1] : vector<4x16x32xf32> to vector<4x32xf32>
    %2 = vector.shape_cast %1 : vector<4x32xf32> to vector<4x1x32xf32>
    %cst_2 = arith.constant 6.250000e-02 : f32
    %3 = vector.broadcast %cst_2 : f32 to vector<4x1x32xf32>
    %4 = arith.mulf %2, %3 : vector<4x1x32xf32>
    %c0_3 = arith.constant 0 : index
    %c0_4 = arith.constant 0 : index
    %c0_5 = arith.constant 0 : index
    %5 = vector.load %arg2[%c0_3, %c0_4, %c0_5] : memref<4x16x32xf32, #tpu.memory_space<vmem>>, vector<4x16x32xf32>
    %6 = vector.broadcast %4 : vector<4x1x32xf32> to vector<4x16x32xf32>
    %7 = arith.subf %5, %6 : vector<4x16x32xf32>
    %8 = arith.mulf %7, %7 : vector<4x16x32xf32>
    %cst_6 = arith.constant dense<0.000000e+00> : vector<4x32xf32>
    %9 = vector.multi_reduction <add>, %8, %cst_6 [1] : vector<4x16x32xf32> to vector<4x32xf32>
    %10 = vector.shape_cast %9 : vector<4x32xf32> to vector<4x1x32xf32>
    %cst_7 = arith.constant 6.250000e-02 : f32
    %11 = vector.broadcast %cst_7 : f32 to vector<4x1x32xf32>
    %12 = arith.mulf %10, %11 : vector<4x1x32xf32>
    %cst_8 = arith.constant 9.99999974E-6 : f32
    %13 = vector.broadcast %cst_8 : f32 to vector<4x1x32xf32>
    %14 = arith.addf %12, %13 : vector<4x1x32xf32>
    %15 = math.rsqrt %14 : vector<4x1x32xf32>
    %cst_9 = arith.constant 9.99999974E-6 : f32
    %16 = vector.broadcast %cst_9 : f32 to vector<4x1x32xf32>
    %17 = arith.addf %12, %16 : vector<4x1x32xf32>
    %18 = math.sqrt %17 : vector<4x1x32xf32>
    %c0_10 = arith.constant 0 : index
    %c0_11 = arith.constant 0 : index
    %19 = vector.load %arg3[%c0_10, %c0_11] : memref<1x32xf32, #tpu.memory_space<vmem>>, vector<1x32xf32>
    %20 = vector.shape_cast %19 : vector<1x32xf32> to vector<1x1x32xf32>
    %c0_12 = arith.constant 0 : index
    %c0_13 = arith.constant 0 : index
    %21 = vector.load %arg4[%c0_12, %c0_13] : memref<1x32xf32, #tpu.memory_space<vmem>>, vector<1x32xf32>
    %22 = vector.shape_cast %21 : vector<1x32xf32> to vector<1x1x32xf32>
    %23 = vector.broadcast %20 : vector<1x1x32xf32> to vector<4x1x32xf32>
    %24 = arith.mulf %15, %23 : vector<4x1x32xf32>
    %25 = arith.mulf %4, %24 : vector<4x1x32xf32>
    %26 = vector.broadcast %22 : vector<1x1x32xf32> to vector<4x1x32xf32>
    %27 = arith.subf %26, %25 : vector<4x1x32xf32>
    %c0_14 = arith.constant 0 : index
    %c0_15 = arith.constant 0 : index
    %c0_16 = arith.constant 0 : index
    %28 = vector.load %arg2[%c0_14, %c0_15, %c0_16] : memref<4x16x32xf32, #tpu.memory_space<vmem>>, vector<4x16x32xf32>
    %29 = vector.broadcast %24 : vector<4x1x32xf32> to vector<4x16x32xf32>
    %30 = arith.mulf %28, %29 : vector<4x16x32xf32>
    %31 = vector.broadcast %27 : vector<4x1x32xf32> to vector<4x16x32xf32>
    %32 = arith.addf %30, %31 : vector<4x16x32xf32>
    %c0_17 = arith.constant 0 : index
    %c0_18 = arith.constant 0 : index
    %c0_19 = arith.constant 0 : index
    %33 = vector.load %arg5[%c0_17, %c0_18, %c0_19] : memref<4x16x32xf32, #tpu.memory_space<vmem>>, vector<4x16x32xf32>
    tpu.vector_store %arg5[%c0_17, %c0_18, %c0_19], %32 {strides = array<i32>} : memref<4x16x32xf32, #tpu.memory_space<vmem>>, vector<4x16x32xf32>,
    %c0_20 = arith.constant 0 : index
    %c0_21 = arith.constant 0 : index
    %c0_22 = arith.constant 0 : index
    %34 = vector.load %arg6[%c0_20, %c0_21, %c0_22] : memref<4x1x32xf32, #tpu.memory_space<vmem>>, vector<4x1x32xf32>
    tpu.vector_store %arg6[%c0_20, %c0_21, %c0_22], %4 {strides = array<i32>} : memref<4x1x32xf32, #tpu.memory_space<vmem>>, vector<4x1x32xf32>,
    %c0_23 = arith.constant 0 : index
    %c0_24 = arith.constant 0 : index
    %c0_25 = arith.constant 0 : index
    %35 = vector.load %arg7[%c0_23, %c0_24, %c0_25] : memref<4x1x32xf32, #tpu.memory_space<vmem>>, vector<4x1x32xf32>
    tpu.vector_store %arg7[%c0_23, %c0_24, %c0_25], %18 {strides = array<i32>} : memref<4x1x32xf32, #tpu.memory_space<vmem>>, vector<4x1x32xf32>,
    return
  }
  func.func @transform_0(%arg0: i32, %arg1: i32) -> (i32, i32, i32) {
    %c0_i32 = arith.constant 0 : i32
    %c0_i32_0 = arith.constant 0 : i32
    return %arg0, %c0_i32, %arg1 : i32, i32, i32
  }
  func.func @transform_1(%arg0: i32, %arg1: i32) -> (i32, i32) {
    %c0_i32 = arith.constant 0 : i32
    %c0_i32_0 = arith.constant 0 : i32
    return %c0_i32, %arg1 : i32, i32
  }
  func.func @transform_2(%arg0: i32, %arg1: i32) -> (i32, i32) {
    %c0_i32 = arith.constant 0 : i32
    %c0_i32_0 = arith.constant 0 : i32
    return %c0_i32, %arg1 : i32, i32
  }
  func.func @transform_3(%arg0: i32, %arg1: i32) -> (i32, i32, i32) {
    %c0_i32 = arith.constant 0 : i32
    %c0_i32_0 = arith.constant 0 : i32
    return %arg0, %c0_i32, %arg1 : i32, i32, i32
  }
  func.func @transform_4(%arg0: i32, %arg1: i32) -> (i32, i32, i32) {
    %c0_i32 = arith.constant 0 : i32
    %c0_i32_0 = arith.constant 0 : i32
    return %arg0, %c0_i32, %arg1 : i32, i32, i32
  }
  func.func @transform_5(%arg0: i32, %arg1: i32) -> (i32, i32, i32) {
    %c0_i32 = arith.constant 0 : i32
    %c0_i32_0 = arith.constant 0 : i32
    return %arg0, %c0_i32, %arg1 : i32, i32, i32
  }
}

</mosaic_0001>

<bundles_post_ra>
// kernel: tpu_custom_call.1
= control target key start
LH: loop header
LB: loop body
LE: loop exit
PB: predicated region body
PF: predicated region fallthrough
CT: control target
= control target key end

     0   :  { %11 = vsyncpa [#allocation3], 0  ;;  %s1500_s0 = inlined_call_operand.hbm [shape: f32[8,16,32], index: 0, kind: input, shape index: {}]   ;;  %s1501_s1 = inlined_call_operand.vmem [shape: f32[1,32], index: 1, kind: input, shape index: {}]   ;;  %s1502_s2 = inlined_call_operand.vmem [shape: f32[1,32], index: 2, kind: input, shape index: {}]   ;;  %s1503_s3 = inlined_call_operand.hbm [shape: f32[8,16,32], index: 3, kind: output, shape index: {0}]   ;;  %s1504_s4 = inlined_call_operand.hbm [shape: f32[8,1,32], index: 4, kind: output, shape index: {1}]   ;;  %s1505_s5 = inlined_call_operand.hbm [shape: f32[8,1,32], index: 5, kind: output, shape index: {2}]  }
   0x1   :  { %13 = vsyncpa [#allocation3 + $0x1], 0 }
   0x2   :  { %14 = vsyncpa [#allocation4], 0 }
   0x3   :  { %16 = vsyncpa [#allocation4 + $0x1], 0 }
   0x4   :  { %17 = vsyncpa [#allocation7], 0 }
   0x5   :  { %19 = vsyncpa [#allocation7 + $0x1], 0  ;;  %s1102_s18 = smov 0   ;;  %s1104_s19 = smov 0  }
   0x6   :  { %s1106_s20 = smov 0   ;;  %s1108_s21 = smov 0  }
   0x7   :  { %s1110_s22 = smov 0   ;;  %s1112_s23 = smov 0  }
   0x8 LB: > { %s1133_s24 = sadd.s32 4294967295, %s1060_s23   ;;  %s1506_s25 = sadd.s32 4294967294, %s1060_s23   ;;  %s1060_s23 = sphi %s1112_s23, %s25_s23   ;;  %s1056_s22 = sphi %s1110_s22, %s1524_s22   ;;  %s1052_s21 = sphi %s1108_s21, %s1523_s21   ;;  %s1048_s20 = sphi %s1106_s20, %s1522_s20   ;;  %s1044_s19 = sphi %s1104_s19, %s1521_s19   ;;  %s1040_s18 = sphi %s1102_s18, %s1520_s18  }
   0x9   : > { %s37_s26 = sadd.s32 1, %s1056_s22  ;;  %s46_s27 = sadd.s32 1, %s1048_s20 }
   0xa   : > { %p39_p0 = scmp.ge.s32.totalorder %s37_s26, 2  ;;  %p53_p1 = scmp.ne.s32.totalorder %s1048_s20, %s1044_s19 }
   0xb   : > { %p54_p2 = scmp.eq.s32.totalorder %s1060_s23, 0  ;;  %p59_p3 = scmp.ne.s32.totalorder %s1044_s19, %s1040_s18 }
   0xc   : > { %s1526_s26 = smov (%p39_p0, %s37_s26), 0  ;;  %p60_p5 = scmp.eq.s32.totalorder %s1133_s24, 0 }
   0xd   : > { %p1145_p4 = por %p54_p2, %p53_p1  ;;  %s41_s29 = ssub.s32 %s1056_s22, %s1526_s26 }
   0xe   : > { %p137_p6 = scmp.eq.s32.totalorder %s1133_s24, 1  ;;  %p44_p7 = scmp.eq.s32.totalorder %s41_s29, 0 }
   0xf   : > { %p1153_p8 = por %p60_p5, %p59_p3  ;;  %p143_p10 = scmp.eq.s32.totalorder %s1506_s25, 1 }
  0x10   : > { %p1157_p9 = por %p137_p6, %p53_p1  ;;  %p832_p13 = scmp.lt.s32.totalorder %s1060_s23, 2 }
  0x11   : > { %s1164_s7 = scalar_select %p44_p7, %s1048_s20, %s46_s27  }
  0x12   : > { %p1166_p11 = por %p143_p10, %p59_p3  ;;  %s231_s9 = sand.u32 1, %s1048_s20  }
  0x13   : > { %s783_s10 = sshll.u32 %s231_s9, 6  ;;  %s805_s11 = sshll.u32 %s1056_s22, 10 }
  0x14   : > { %s243_s14 = scalar_lea.hbm %s1500_s0, %s805_s11  ;;  %s235_s15 = scalar_lea.vmem [#allocation2], %s783_s10 }
  0x15   : > { %s244_s16 = sshll.u32 %s235_s15, 4  ;;  %p1179_p0 = pnand %p832_p13, %p1145_p4  ;;  %s245_s16 = int_to_ptr.vmem [resolvable:$true] %s244_s16 }
  0x16   : > { %p787_p1 = scmp.ge.s32.totalorder %s1060_s23, 1  ;;  %s232_s27 = scalar_lea.sflag [#allocation3], %s231_s9 }
  0x17   : > { %p898_p2 = pneg %p1179_p0  ;;  %s909_s29 = scalar_lea.vmem %s245_s16, 1024 }
  0x18   : > { %p910_p3 = scmp.ne.s32.totalorder %s245_s16, %s909_s29  ;;  %s1062_s25 = smov [#allocation2]  }
  0x19   : > { %s914_s12 = sshll.u32 %s1062_s25, 4  ;;  %s915_s12 = int_to_ptr.vmem [resolvable:$false] %s914_s12 }
  0x1a   : > { %p912_p5 = pnand %p910_p3, %p898_p2  ;;  %s916_s10 = scalar_lea.vmem %s915_s12, 2048 }
  0x1b   : > { %p917_p7 = scmp.lt.s32.totalorder %s245_s16, %s915_s12  ;;  %p918_p10 = scmp.lt.s32.totalorder %s916_s10, %s909_s29 }
  0x1c   : > { %p913_p6 = pneg %p912_p5 }
  0x1d   : > { %p919_p12 = por %p918_p10, %p917_p7 }
  0x1f   : > { %p920_p4 = pnand %p919_p12, %p913_p6 }
  0x21   : > { %923 = shalt.err (!%p920_p4)
}
  0x22   : > { %s1063_s28 = smov 128   ;;  %s1064_s9 = smov 8  }
  0x23   : > { %821 = dma.hbm_to_vmem [thread:$0]  (!%p1179_p0), %s243_s14, 1024, %s245_s16, %s232_s27, %s1063_s28, %s1063_s28, %s1064_s9  }
  0x24   : > { %p252_p13 = scmp.lt.s32.totalorder %s1060_s23, 3 }
  0x26   : > { %p253_p2 = pnand %p787_p1, %p252_p13 }
  0x27   : > { %s1192_s25 = sand.u32 (!%p253_p2), 1, %s1044_s19  }
  0x28   : > { %256 = sbr.rel (%p253_p2) target bundleno = 169 (0xa9), region = 32  ;;  %s788_s11 = sshll.u32 (!%p253_p2), %s1192_s25, 6 }
  0x29   : > { %s259_s13 = scalar_lea.sflag (!%p253_p2), [#allocation3], %s1192_s25  ;;  %s262_s15 = scalar_lea.vmem (!%p253_p2), [#allocation2], %s788_s11 }
  0x2d   : > { %1027 = dma.done.wait (%p1153_p8), %s259_s13, 1024  }
  0x2e   : > { %1029 = vsyncadd (%p1153_p8), %s259_s13, 4294966272  ;;  %vm323_vm0 = vcmask 261120   ;;  %v1202_v0 = vld [vmem:[%s262_s15] sm:$0xff]  ;;  %v1204_v1 = vld [vmem:[%s262_s15 + $0x8] sm:$0xff]  ;;  %s790_s30 = sshll.u32 %s1192_s25, 2  ;;  %s548_s17 = sand.u32 1, %s1133_s24  }
  0x2f   : > { %v1206_v2 = vld [vmem:[%s262_s15 + $0x10] sm:$0xff]  ;;  %v324_v3 = vsel %vm323_vm0, %v1202_v0, 0.0  ;;  %v325_v4 = vsel %vm323_vm0, %v1204_v1, 0.0  ;;  %v1212_v5 = vld [vmem:[%s262_s15 + $0x18] sm:$0xff]  ;;  %v1216_v7 = vld [vmem:[%s262_s15 + $0x20] sm:$0xff]  ;;  %s1237_s14 = scalar_lea.vmem [#allocation6], %s790_s30 }
  0x30   : > { %v333_v6 = vsel %vm323_vm0, %v1206_v2, 0.0  ;;  %v1218_v8 = vld [vmem:[%s262_s15 + $0x28] sm:$0xff]  ;;  %v326_v9 = vadd.f32 %v325_v4, %v324_v3  ;;  %v334_v10 = vsel %vm323_vm0, %v1212_v5, 0.0  ;;  %v342_v11 = vsel %vm323_vm0, %v1216_v7, 0.0  ;;  %v1226_v13 = vld [vmem:[%s262_s15 + $0x30] sm:$0xff]  ;;  %v1228_v14 = vld [vmem:[%s262_s15 + $0x38] sm:$0xff] }
  0x31   : > { %v343_v12 = vsel %vm323_vm0, %v1218_v8, 0.0  ;;  %v335_v15 = vadd.f32 %v334_v10, %v333_v6  ;;  %v351_v17 = vsel %vm323_vm0, %v1226_v13, 0.0  ;;  %v352_v18 = vsel %vm323_vm0, %v1228_v14, 0.0  ;;  %s586_s16 = sshll.u32 %s1237_s14, 4  ;;  %s1507_s27 = sshll.u32 %s1052_s21, 6  ;;  %s1244_s16 = int_to_ptr.vmem [resolvable:$true] %s586_s16 }
  0x32   : > { %v344_v16 = vadd.f32 %v343_v12, %v342_v11  ;;  %v327_v19 = vrot.slane %v326_v9, 4  ;;  %v353_v20 = vadd.f32 %v352_v18, %v351_v17  ;;  %vm534_vm1 = vcmask 253952   ;;  %s1264_s12 = scalar_lea.hbm %s1504_s4, %s1507_s27  ;;  %s1287_s10 = scalar_lea.sflag [#allocation7], %s548_s17 }
  0x33   : > { %v336_v21 = vrot.slane %v335_v15, 4  ;;  %s924_s28 = scalar_lea.vmem %s1244_s16, 64  ;;  %s1065_s9 = smov [#allocation6]  }
  0x34   : > { %v345_v22 = vrot.slane %v344_v16, 4  ;;  %v328_v23 = vadd.f32 %v327_v19, %v326_v9  ;;  %v354_v24 = vrot.slane %v353_v20, 4  ;;  %p925_p8 = scmp.ne.s32.totalorder %s1244_s16, %s924_s28  ;;  %s928_s13 = sshll.u32 %s1065_s9, 4  ;;  %s929_s13 = int_to_ptr.vmem [resolvable:$false] %s928_s13 }
  0x35   : > { %v337_v25 = vadd.f32 %v336_v21, %v335_v15  ;;  %s930_s15 = scalar_lea.vmem %s929_s13, 128  ;;  %p931_p1 = scmp.lt.s32.totalorder %s1244_s16, %s929_s13 }
  0x36   : > { %v346_v26 = vadd.f32 %v345_v22, %v344_v16  ;;  %v329_v27 = vrot.slane %v328_v23, 2  ;;  %v355_v28 = vadd.f32 %v354_v24, %v353_v20  ;;  %p926_p12 = pnand %p925_p8, %p1157_p9  ;;  %p932_p3 = scmp.lt.s32.totalorder %s930_s15, %s924_s28 }
  0x37   : > { %v338_v29 = vrot.slane %v337_v25, 2 }
  0x38   : > { %v347_v30 = vrot.slane %v346_v26, 2  ;;  %v330_v31 = vadd.f32 %v329_v27, %v328_v23  ;;  %v356_v32 = vrot.slane %v355_v28, 2  ;;  %p927_p0 = pneg %p926_p12  ;;  %p933_p5 = por %p932_p3, %p931_p1 }
  0x39   : > { %v339_v33 = vadd.f32 %v338_v29, %v337_v25 }
  0x3a   : > { %v348_v34 = vadd.f32 %v347_v30, %v346_v26  ;;  %v331_v35 = vrot.slane %v330_v31, 1  ;;  %v357_v36 = vadd.f32 %v356_v32, %v355_v28  ;;  %p934_p6 = pnand %p933_p5, %p927_p0 }
  0x3b   : > { %v340_v37 = vrot.slane %v339_v33, 1 }
  0x3c   : > { %v349_v38 = vrot.slane %v348_v34, 1  ;;  %v332_v39 = vadd.f32 %v331_v35, %v330_v31  ;;  %v358_v40 = vrot.slane %v357_v36, 1 }
  0x3d   : > { %v341_v41 = vadd.f32 %v340_v37, %v339_v33 }
  0x3e   : > { %v350_v42 = vadd.f32 %v349_v38, %v348_v34  ;;  %v1242_v43 = vmul.f32 0.0625, %v332_v39  ;;  %v359_v44 = vadd.f32 %v358_v40, %v357_v36 }
  0x3f   : > { %v1246_v45 = vmul.f32 0.0625, %v341_v41 }
  0x40   : > { %v1248_v46 = vmul.f32 0.0625, %v350_v42  ;;  %v364_v47 = vsub.f32 %v1202_v0, %v1242_v43  ;;  %v365_v48 = vsub.f32 %v1204_v1, %v1242_v43  ;;  %535 = vst.msk [vmem:[%s1237_s14] sm:$0x1] %vm534_vm1, %v1242_v43  ;;  %v1257_v49 = vmul.f32 0.0625, %v359_v44 }
  0x41   : > { %v366_v50 = vsub.f32 %v1206_v2, %v1246_v45  ;;  %v367_v51 = vsub.f32 %v1212_v5, %v1246_v45  ;;  %536 = vst.msk [vmem:[%s1237_s14 + $0x1] sm:$0x1] %vm534_vm1, %v1246_v45 }
  0x42   : > { %v368_v52 = vsub.f32 %v1216_v7, %v1248_v46  ;;  %v369_v53 = vsub.f32 %v1218_v8, %v1248_v46  ;;  %537 = vst.msk [vmem:[%s1237_s14 + $0x2] sm:$0x1] %vm534_vm1, %v1248_v46  ;;  %v372_v54 = vmul.f32 %v364_v47, %v364_v47  ;;  %v373_v55 = vmul.f32 %v365_v48, %v365_v48 }
  0x43   : > { %v370_v56 = vsub.f32 %v1226_v13, %v1257_v49  ;;  %v371_v57 = vsub.f32 %v1228_v14, %v1257_v49  ;;  %538 = vst.msk [vmem:[%s1237_s14 + $0x3] sm:$0x1] %vm534_vm1, %v1257_v49  ;;  %v374_v58 = vmul.f32 %v366_v50, %v366_v50  ;;  %v375_v59 = vmul.f32 %v367_v51, %v367_v51 }
  0x44   : > { %v376_v60 = vmul.f32 %v368_v52, %v368_v52  ;;  %v377_v61 = vmul.f32 %v369_v53, %v369_v53 }
  0x45   : > { %937 = shalt.err (!%p934_p6)
}
  0x46   : > { %s938_s14 = scalar_lea.hbm %s1264_s12, 64  ;;  %s942_s29 = scalar_lea.hbm %s1504_s4, 128 }
  0x47   : > { %p939_p7 = scmp.ne.s32.totalorder %s1264_s12, %s938_s14  ;;  %p943_p13 = scmp.lt.s32.totalorder %s1264_s12, %s1504_s4 }
  0x48   : > { %p944_p2 = scmp.lt.s32.totalorder %s942_s29, %s938_s14 }
  0x49   : > { %p940_p10 = pnand %p939_p7, %p1157_p9 }
  0x4a   : > { %p945_p8 = por %p944_p2, %p943_p13 }
  0x4b   : > { %p941_p4 = pneg %p940_p10 }
  0x4d   : > { %p946_p12 = pnand %p945_p8, %p941_p4 }
  0x4f   : > { %949 = shalt.err (!%p946_p12)
}
  0x50   : > { %s1508_s28 = smov 16   ;;  %s1509_s13 = smov 1   ;;  %v380_v62 = vsel %vm323_vm0, %v372_v54, 0.0  ;;  %v381_v63 = vsel %vm323_vm0, %v373_v55, 0.0  ;;  %v378_v3 = vmul.f32 %v370_v56, %v370_v56  ;;  %v379_v4 = vmul.f32 %v371_v57, %v371_v57 }
  0x51   : > { %813 = dma.vmem_to_hbm [thread:$0]  (%p1157_p9), %s1244_s16, 64, %s1264_s12, %s1287_s10, %s1508_s28, %s1508_s28, %s1509_s13   ;;  %v382_v6 = vadd.f32 %v381_v63, %v380_v62  ;;  %v389_v9 = vsel %vm323_vm0, %v374_v58, 0.0  ;;  %v390_v10 = vsel %vm323_vm0, %v375_v59, 0.0  ;;  %v398_v11 = vsel %vm323_vm0, %v376_v60, 0.0 }
  0x52   : > { %v391_v12 = vadd.f32 %v390_v10, %v389_v9  ;;  %v399_v15 = vsel %vm323_vm0, %v377_v61, 0.0  ;;  %v407_v16 = vsel %vm323_vm0, %v378_v3, 0.0  ;;  %v408_v17 = vsel %vm323_vm0, %v379_v4, 0.0  ;;  %v456_v58 = vld [vmem:[%s1501_s1] sm:$0x1]  ;;  %s1353_s14 = scalar_lea.vmem [#allocation8], %s790_s30 }
  0x53   : > { %v383_v18 = vrot.slane %v382_v6, 4  ;;  %v400_v19 = vadd.f32 %v399_v15, %v398_v11  ;;  %v409_v20 = vadd.f32 %v408_v17, %v407_v16  ;;  %v470_v56 = vlaneseq  ;;  %v457_v9 = vld [vmem:[%s1502_s2] sm:$0x1]  ;;  %s1362_s17 = scalar_lea.vmem [#allocation5], %s788_s11  ;;  %s807_s11 = sshll.u32 %s1052_s21, 10 }
  0x54   : > { %v392_v21 = vrot.slane %v391_v12, 4  ;;  %s569_s30 = sshll.u32 %s1362_s17, 4  ;;  %s603_s24 = sshll.u32 %s1353_s14, 4  ;;  %s1375_s30 = int_to_ptr.vmem [resolvable:$true] %s569_s30  ;;  %s1401_s24 = int_to_ptr.vmem [resolvable:$true] %s603_s24 }
  0x55   : > { %v384_v22 = vadd.f32 %v383_v18, %v382_v6  ;;  %v401_v23 = vrot.slane %v400_v19, 4  ;;  %v410_v24 = vrot.slane %v409_v20, 4  ;;  %v471_v57 = vshrl.u32 %v470_v56, 7  ;;  %s1399_s16 = scalar_lea.hbm %s1503_s3, %s807_s11  ;;  %s1515_s27 = sshll.u32 %s1052_s21, 6 }
  0x56   : > { %v393_v25 = vadd.f32 %v392_v21, %v391_v12  ;;  %s1414_s28 = scalar_lea.hbm %s1505_s5, %s1515_s27  ;;  %s544_s21 = scalar_lea.sflag [#allocation4], %s1192_s25 }
  0x57   : > { %v385_v26 = vrot.slane %v384_v22, 2  ;;  %v402_v27 = vadd.f32 %v401_v23, %v400_v19  ;;  %v411_v28 = vadd.f32 %v410_v24, %v409_v20  ;;  %v472_v59 = vsub.s32 0, %v471_v57  ;;  %s950_s11 = scalar_lea.vmem %s1375_s30, 1024  ;;  %s1068_s29 = smov [#allocation5]  }
  0x58   : > { %v394_v29 = vrot.slane %v393_v25, 2  ;;  %p951_p0 = scmp.ne.s32.totalorder %s1375_s30, %s950_s11  ;;  %s954_s9 = sshll.u32 %s1068_s29, 4  ;;  %s955_s9 = int_to_ptr.vmem [resolvable:$false] %s954_s9 }
  0x59   : > { %v386_v30 = vadd.f32 %v385_v26, %v384_v22  ;;  %v403_v31 = vrot.slane %v402_v27, 2  ;;  %v412_v32 = vrot.slane %v411_v28, 2  ;;  %p957_p5 = scmp.lt.s32.totalorder %s1375_s30, %s955_s9 }
  0x5a   : > { %v395_v33 = vadd.f32 %v394_v29, %v393_v25  ;;  %p952_p1 = pnand %p951_p0, %p1157_p9 }
  0x5b   : > { %v387_v34 = vrot.slane %v386_v30, 1  ;;  %v404_v35 = vadd.f32 %v403_v31, %v402_v27  ;;  %v413_v36 = vadd.f32 %v412_v32, %v411_v28 }
  0x5c   : > { %v396_v37 = vrot.slane %v395_v33, 1  ;;  %p953_p3 = pneg %p952_p1 }
  0x5d   : > { %v388_v38 = vadd.f32 %v387_v34, %v386_v30  ;;  %v405_v39 = vrot.slane %v404_v35, 1  ;;  %v414_v40 = vrot.slane %v413_v36, 1 }
  0x5e   : > { %v397_v41 = vadd.f32 %v396_v37, %v395_v33 }
  0x5f   : > { %v416_v42 = vmul.f32 0.0625, %v388_v38  ;;  %v406_v44 = vadd.f32 %v405_v39, %v404_v35  ;;  %v415_v47 = vadd.f32 %v414_v40, %v413_v36 }
  0x60   : > { %v417_v48 = vmul.f32 0.0625, %v397_v41 }
  0x61   : > { %v420_v50 = vadd.f32 1e-05, %v416_v42  ;;  %v418_v51 = vmul.f32 0.0625, %v406_v44  ;;  %v419_v52 = vmul.f32 0.0625, %v415_v47 }
  0x62   : > { %v1321_v53 = vadd.f32 1e-05, %v417_v48 }
  0x63   : > { %v1323_v54 = vadd.f32 1e-05, %v418_v51  ;;  %v1325_v55 = vadd.f32 1e-05, %v419_v52  ;;  %888 = vrsqrt.f32 %v420_v50  ;;  %vm430_vm2 = vcmp.eq.f32.partialorder %v420_v50, inf }
  0x64   : > { %890 = vrsqrt.f32 %v1321_v53  ;;  %vm432_vm3 = vcmp.eq.f32.partialorder %v420_v50, 0.0  ;;  %v433_v61 = vand.u32 2147483648, %v420_v50  ;;  %vm437_vm4 = vcmp.eq.f32.partialorder %v1321_v53, inf }
  0x65   : > { %892 = vrsqrt.f32 %v1323_v54  ;;  %vm439_vm5 = vcmp.eq.f32.partialorder %v1321_v53, 0.0  ;;  %v440_v4 = vand.u32 2147483648, %v1321_v53  ;;  %v447_v12 = vand.u32 2147483648, %v1323_v54 }
  0x66   : > { %894 = vrsqrt.f32 %v1325_v55  ;;  %v454_v15 = vand.u32 2147483648, %v1325_v55  ;;  %vm444_vm6 = vcmp.eq.f32.partialorder %v1323_v54, inf  ;;  %vm451_vm7 = vcmp.eq.f32.partialorder %v1325_v55, inf }
  0x67   : > { %vm446_vm8 = vcmp.eq.f32.partialorder %v1323_v54, 0.0  ;;  %vm453_vm9 = vcmp.eq.f32.partialorder %v1325_v55, 0.0 }
  0x70   : > { %v889_v60 = vpop.eup %888 }
  0x71   : > { %v891_v62 = vpop.eup %890  ;;  %v458_v63 = vmul.f32 %v889_v60, %v456_v58  ;;  %v429_v3 = vmul.f32 %v889_v60, %v420_v50 }
  0x72   : > { %v893_v6 = vpop.eup %892  ;;  %v459_v10 = vmul.f32 %v891_v62, %v456_v58  ;;  %v436_v11 = vmul.f32 %v891_v62, %v1321_v53 }
  0x73   : > { %v895_v16 = vpop.eup %894  ;;  %v462_v17 = vmul.f32 %v458_v63, %v1242_v43  ;;  %v473_v18 = vrot.slane %v458_v63, %v472_v59  ;;  %v460_v19 = vmul.f32 %v893_v6, %v456_v58  ;;  %v431_v20 = vsel %vm430_vm2, %v420_v50, %v429_v3 }
  0x74   : > { %v463_v21 = vmul.f32 %v459_v10, %v1246_v45  ;;  %v477_v22 = vrot.slane %v459_v10, %v472_v59  ;;  %v461_v23 = vmul.f32 %v895_v16, %v456_v58  ;;  %v434_v24 = vsel %vm432_vm3, %v433_v61, %v431_v20 }
  0x75   : > { %v466_v25 = vsub.f32 %v457_v9, %v462_v17  ;;  %v486_v26 = vmul.f32 %v473_v18, %v1202_v0  ;;  %v487_v43 = vmul.f32 %v473_v18, %v1204_v1  ;;  %v464_v27 = vmul.f32 %v460_v19, %v1248_v46  ;;  %539 = vst.msk [vmem:[%s1353_s14] sm:$0x1] %vm534_vm1, %v434_v24 }
  0x76   : > { %v467_v28 = vsub.f32 %v457_v9, %v463_v21  ;;  %v488_v45 = vmul.f32 %v477_v22, %v1206_v2  ;;  %v489_v29 = vmul.f32 %v477_v22, %v1212_v5  ;;  %v481_v30 = vrot.slane %v460_v19, %v472_v59 }
  0x77   : > { %v501_v31 = vrot.slane %v466_v25, %v472_v59  ;;  %v468_v32 = vsub.f32 %v457_v9, %v464_v27  ;;  %v465_v0 = vmul.f32 %v461_v23, %v1257_v49  ;;  %v485_v1 = vrot.slane %v461_v23, %v472_v59 }
  0x78   : > { %v505_v46 = vrot.slane %v467_v28, %v472_v59  ;;  %v490_v33 = vmul.f32 %v481_v30, %v1216_v7  ;;  %v491_v2 = vmul.f32 %v481_v30, %v1218_v8  ;;  %v438_v5 = vsel %vm437_vm4, %v1321_v53, %v436_v11 }
  0x79   : > { %v518_v49 = vadd.f32 %v501_v31, %v486_v26  ;;  %v519_v34 = vadd.f32 %v501_v31, %v487_v43  ;;  %v509_v35 = vrot.slane %v468_v32, %v472_v59  ;;  %v469_v36 = vsub.f32 %v457_v9, %v465_v0 }
  0x7a   : > { %v520_v37 = vadd.f32 %v505_v46, %v488_v45  ;;  %v521_v38 = vadd.f32 %v505_v46, %v489_v29  ;;  %v492_v39 = vmul.f32 %v485_v1, %v1226_v13  ;;  %v493_v7 = vmul.f32 %v485_v1, %v1228_v14 }
  0x7b   : > { %526 = vst.msk [vmem:[%s1362_s17] sm:$0xff] %vm323_vm0, %v518_v49  ;;  %527 = vst.msk [vmem:[%s1362_s17 + $0x8] sm:$0xff] %vm323_vm0, %v519_v34  ;;  %v522_v8 = vadd.f32 %v509_v35, %v490_v33  ;;  %v523_v40 = vadd.f32 %v509_v35, %v491_v2  ;;  %v513_v41 = vrot.slane %v469_v36, %v472_v59 }
  0x7c   : > { %v441_v42 = vsel %vm439_vm5, %v440_v4, %v438_v5  ;;  %528 = vst.msk [vmem:[%s1362_s17 + $0x10] sm:$0xff] %vm323_vm0, %v520_v37  ;;  %529 = vst.msk [vmem:[%s1362_s17 + $0x18] sm:$0xff] %vm323_vm0, %v521_v38  ;;  %v443_v13 = vmul.f32 %v893_v6, %v1323_v54  ;;  %v450_v14 = vmul.f32 %v895_v16, %v1325_v55 }
  0x7d   : > { %540 = vst.msk [vmem:[%s1353_s14 + $0x1] sm:$0x1] %vm534_vm1, %v441_v42  ;;  %v524_v44 = vadd.f32 %v513_v41, %v492_v39  ;;  %v525_v47 = vadd.f32 %v513_v41, %v493_v7 }
  0x7e   : > { %530 = vst.msk [vmem:[%s1362_s17 + $0x20] sm:$0xff] %vm323_vm0, %v522_v8  ;;  %531 = vst.msk [vmem:[%s1362_s17 + $0x28] sm:$0xff] %vm323_vm0, %v523_v40  ;;  %v445_v48 = vsel %vm444_vm6, %v1323_v54, %v443_v13  ;;  %v452_v50 = vsel %vm451_vm7, %v1325_v55, %v450_v14 }
  0x7f   : > { %532 = vst.msk [vmem:[%s1362_s17 + $0x30] sm:$0xff] %vm323_vm0, %v524_v44  ;;  %533 = vst.msk [vmem:[%s1362_s17 + $0x38] sm:$0xff] %vm323_vm0, %v525_v47  ;;  %v448_v51 = vsel %vm446_vm8, %v447_v12, %v445_v48  ;;  %v455_v52 = vsel %vm453_vm9, %v454_v15, %v452_v50  ;;  %s956_s17 = scalar_lea.vmem %s955_s9, 2048 }
  0x80   : > { %541 = vst.msk [vmem:[%s1353_s14 + $0x2] sm:$0x1] %vm534_vm1, %v448_v51  ;;  %542 = vst.msk [vmem:[%s1353_s14 + $0x3] sm:$0x1] %vm534_vm1, %v455_v52  ;;  %p958_p6 = scmp.lt.s32.totalorder %s956_s17, %s950_s11 }
  0x82   : > { %p959_p7 = por %p958_p6, %p957_p5 }
  0x84   : > { %p960_p10 = pnand %p959_p7, %p953_p3 }
  0x86   : > { %963 = shalt.err (!%p960_p10)
}
  0x87   : > { %s964_s14 = scalar_lea.hbm %s1399_s16, 1024  ;;  %s968_s15 = scalar_lea.hbm %s1503_s3, 2048 }
  0x88   : > { %p965_p4 = scmp.ne.s32.totalorder %s1399_s16, %s964_s14  ;;  %p969_p8 = scmp.lt.s32.totalorder %s1399_s16, %s1503_s3 }
  0x89   : > { %p970_p12 = scmp.lt.s32.totalorder %s968_s15, %s964_s14 }
  0x8a   : > { %p966_p13 = pnand %p965_p4, %p1157_p9 }
  0x8b   : > { %p971_p0 = por %p970_p12, %p969_p8 }
  0x8c   : > { %p967_p2 = pneg %p966_p13 }
  0x8e   : > { %p972_p1 = pnand %p971_p0, %p967_p2 }
  0x90   : > { %975 = shalt.err (!%p972_p1)
}
  0x91   : > { %s1069_s11 = smov 128   ;;  %s1070_s9 = smov 8  }
  0x92   : > { %812 = dma.vmem_to_hbm [thread:$0]  (%p1157_p9), %s1375_s30, 1024, %s1399_s16, %s544_s21, %s1069_s11, %s1069_s11, %s1070_s9  }
  0x93   : > { %s976_s17 = scalar_lea.vmem %s1401_s24, 64  ;;  %s1071_s13 = smov [#allocation8]  }
  0x94   : > { %p977_p3 = scmp.ne.s32.totalorder %s1401_s24, %s976_s17  ;;  %s980_s14 = sshll.u32 %s1071_s13, 4  ;;  %s981_s14 = int_to_ptr.vmem [resolvable:$false] %s980_s14 }
  0x95   : > { %s982_s27 = scalar_lea.vmem %s981_s14, 128  ;;  %p983_p7 = scmp.lt.s32.totalorder %s1401_s24, %s981_s14 }
  0x96   : > { %p978_p5 = pnand %p977_p3, %p1157_p9  ;;  %p984_p10 = scmp.lt.s32.totalorder %s982_s27, %s976_s17 }
  0x98   : > { %p979_p6 = pneg %p978_p5  ;;  %p985_p4 = por %p984_p10, %p983_p7 }
  0x9a   : > { %p986_p13 = pnand %p985_p4, %p979_p6 }
  0x9c   : > { %989 = shalt.err (!%p986_p13)
}
  0x9d   : > { %s990_s25 = scalar_lea.hbm %s1414_s28, 64  ;;  %s994_s21 = scalar_lea.hbm %s1505_s5, 128 }
  0x9e   : > { %p991_p2 = scmp.ne.s32.totalorder %s1414_s28, %s990_s25  ;;  %p995_p0 = scmp.lt.s32.totalorder %s1414_s28, %s1505_s5 }
  0x9f   : > { %p996_p1 = scmp.lt.s32.totalorder %s994_s21, %s990_s25 }
  0xa0   : > { %p992_p8 = pnand %p991_p2, %p1157_p9 }
  0xa1   : > { %p997_p3 = por %p996_p1, %p995_p0 }
  0xa2   : > { %p993_p12 = pneg %p992_p8 }
  0xa4   : > { %p998_p5 = pnand %p997_p3, %p993_p12 }
  0xa6   : > { %1001 = shalt.err (!%p998_p5)
}
  0xa7   : > { %s1516_s29 = smov 1   ;;  %s1517_s11 = smov 16  }
  0xa8   : > { %814 = dma.vmem_to_hbm [thread:$0]  (%p1157_p9), %s1401_s24, 64, %s1414_s28, %s1287_s10, %s1517_s11, %s1517_s11, %s1516_s29  }
  0xa9 PF: > { %s618_s9 = sand.u32 1, %s1040_s18   ;;  %p1518_p6 = scmp.ge.s32.totalorder %s1060_s23, 2 }
  0xaa   : > { %s619_s17 = scalar_lea.sflag [#allocation4], %s618_s9 }
  0xab   : > { %p823_p7 = pnand %p1518_p6, %p1166_p11 }
  0xad   : > { %p824_p10 = pneg %p823_p7 }
  0xaf   : > { %1031 = dma.done.wait (%p824_p10), %s619_s17, 1024  }
  0xb0   : > { %1033 = vsyncadd (%p824_p10), %s619_s17, 4294966272  ;;  %s1519_s6 = sadd.s32 4294967294, %s1060_s23  }
  0xb1   : > { %s627_s13 = sand.u32 1, %s1519_s6  }
  0xb2   : > { %s628_s14 = scalar_lea.sflag [#allocation7], %s627_s13 }
  0xb3   : > { %1035 = dma.done.wait (%p824_p10), %s628_s14, 128  }
  0xb4   : > { %1037 = vsyncadd (%p824_p10), %s628_s14, 4294967168  ;;  %s25_s23 = sadd.s32 1, %s1060_s23   ;;  %s1520_s18 = smov %s1044_s19 }
  0xb5   : > { %p22_p9 = scmp.ge.s32.totalorder %s25_s23, 4   ;;  %s1521_s19 = smov %s1048_s20 }
  0xb6   : > { %s1522_s20 = smov %s1164_s7  ;;  %s1523_s21 = smov %s1056_s22 }
  0xb7   : > { %s1524_s22 = smov %s1526_s26  ;;  %24 = sbr.rel (!%p22_p9) target bundleno = 8 (0x8), region = 115 }
  0xbc   :  { %642 = vsyncpa [#allocation3], 1 }
  0xbd   :  { %644 = vsyncpa [#allocation3 + $0x1], 1 }
  0xbe   :  { %645 = vsyncpa [#allocation4], 1 }
  0xbf   :  { %647 = vsyncpa [#allocation4 + $0x1], 1 }
  0xc0   :  { %648 = vsyncpa [#allocation7], 1 }
  0xc1   :  { %650 = vsyncpa [#allocation7 + $0x1], 1 }

</bundles_post_ra>
